<compile_context>
chip_gen: v5e
topology: v5e:2x2
jax: 0.10.0
libtpu: 0.0.40
codegen_flags: <defaults>
</compile_context>

<pallas_src>
import jax
import jax.numpy as jnp
from jax.experimental import pallas as pl
from jax.experimental.pallas import tpu as pltpu

LANES = 128


def _tanhexp_kernel(x_ref, o_ref):
    x = x_ref[...]
    if x.dtype == jnp.float16:
        # No native f16 transcendental path; compute in f32.
        x = x.astype(jnp.float32)
    # exp/tanh -> EUP slot, mul -> VPU slot; HBM DMA is the expected bottleneck.
    o_ref[...] = (x * jnp.tanh(jnp.exp(x))).astype(o_ref.dtype)


def _tanhexp_jnp(x):
    xf = x.astype(jnp.float32)
    return (xf * jnp.tanh(jnp.exp(xf))).astype(x.dtype)


def _round_up(v: int, m: int) -> int:
    return -(-v // m) * m


def _pick_tiling(rows: int, itemsize: int):
    """Pick (tile_rows, num_tiles) for a (rows, 128) slab.

    ~1 MiB per tile buffer, >= 8 grid steps when the array is big enough
    (keeps prefetch/writeback hidden and feeds both v7x TensorCores), and an
    even step count so megacore splits the 1-D grid evenly.
    """
    target_bytes = 1 << 20  # ~1 MiB per buffer
    cap = max(8, (target_bytes // (LANES * itemsize)) // 8 * 8)

    min_steps = 8  # >= 4 steps per TC on v7x, 8 on v5e/v6e
    per_step = _round_up(pl.cdiv(rows, min_steps), 8)
    tile_rows = max(8, min(cap, per_step))
    num_tiles = pl.cdiv(rows, tile_rows)

    # Prefer an even number of grid steps (v7x megacore: 2 TCs share the grid).
    if num_tiles > 1 and num_tiles % 2 == 1:
        alt_rows = max(8, _round_up(pl.cdiv(rows, num_tiles + 1), 8))
        alt_tiles = pl.cdiv(rows, alt_rows)
        if alt_tiles % 2 == 0:
            tile_rows, num_tiles = alt_rows, alt_tiles

    return tile_rows, num_tiles


def tanhexp_pallas(x: jax.Array) -> jax.Array:
    """Elementwise x * tanh(exp(x)) via a Pallas TPU kernel (any shape/dtype)."""
    orig_shape = x.shape
    orig_dtype = x.dtype
    n = x.size
    if n == 0:
        return x

    flat = x.reshape(-1)
    n_main = (n // LANES) * LANES

    if n_main == 0:
        # Entire tensor smaller than one lane row: kernel launch not worth it.
        return _tanhexp_jnp(flat).reshape(orig_shape)

    main = flat if n_main == n else flat[:n_main]
    rows = n_main // LANES
    x2d = main.reshape(rows, LANES)

    itemsize = jnp.dtype(orig_dtype).itemsize
    tile_rows, num_tiles = _pick_tiling(rows, itemsize)

    out2d = pl.pallas_call(
        _tanhexp_kernel,
        out_shape=jax.ShapeDtypeStruct((rows, LANES), orig_dtype),
        grid=(num_tiles,),
        in_specs=[pl.BlockSpec((tile_rows, LANES), lambda i: (i, 0))],
        out_specs=pl.BlockSpec((tile_rows, LANES), lambda i: (i, 0)),
        compiler_params=pltpu.CompilerParams(
            dimension_semantics=("parallel",)
        ),
        cost_estimate=pl.CostEstimate(
            flops=n_main,
            transcendentals=2 * n_main,
            bytes_accessed=2 * n_main * itemsize,
        ),
    )(x2d)

    out_flat = out2d.reshape(-1)
    if n_main != n:
        # <128-element tail: plain jnp (avoids full-array pad/unpad copies).
        tail = _tanhexp_jnp(flat[n_main:])
        out_flat = jnp.concatenate([out_flat, tail])
    return out_flat.reshape(orig_shape)


def tanhexp_ref(x):
    return x * jnp.tanh(jnp.exp(x))


if __name__ == "__main__":
    key = jax.random.PRNGKey(0)

    # NCHW, as the PyTorch module would receive from a conv stack.
    x = jax.random.normal(key, (2, 4, 16, 16), dtype=jnp.float32)
    out = jax.block_until_ready(tanhexp_pallas(x))
    ref = tanhexp_ref(x)
    assert out.shape == x.shape
    assert out.dtype == x.dtype
    assert jnp.allclose(out, ref, atol=1e-5, rtol=1e-5), "mismatch vs reference"

    # Non-128-aligned size exercises the jnp tail path (no pad/unpad copies).
    k2 = jax.random.PRNGKey(1)
    y = jax.random.normal(k2, (3, 5, 7, 11), dtype=jnp.float32)
    out_y = jax.block_until_ready(tanhexp_pallas(y))
    assert out_y.shape == y.shape
    assert jnp.allclose(out_y, tanhexp_ref(y), atol=1e-5, rtol=1e-5), "tail mismatch"

    print("KERNEL_OK")
</pallas_src>

<mosaic_0001>
module attributes {stable_mosaic.version = 11 : i64} {
  func.func @_tanhexp_kernel(%arg0: i32, %arg1: memref<8x128xf32, #tpu.memory_space<vmem>>, %arg2: memref<8x128xf32, #tpu.memory_space<vmem>>) attributes {dimension_semantics = [#tpu.dimension_semantics<parallel>], iteration_bounds = array<i64: 2>, scalar_prefetch = 0 : i64, scratch_operands = 0 : i64, tpu.core_type = #tpu.core_type<tc>, window_params = [{transform_indices = @transform_0, window_bounds = array<i64: 8, 128>}, {transform_indices = @transform_1, window_bounds = array<i64: 8, 128>}]} {
    %c0 = arith.constant 0 : index
    %c0_0 = arith.constant 0 : index
    %0 = vector.load %arg1[%c0, %c0_0] : memref<8x128xf32, #tpu.memory_space<vmem>>, vector<8x128xf32>
    %1 = math.exp %0 : vector<8x128xf32>
    %2 = math.tanh %1 : vector<8x128xf32>
    %3 = arith.mulf %0, %2 : vector<8x128xf32>
    %c0_1 = arith.constant 0 : index
    %c0_2 = arith.constant 0 : index
    %4 = vector.load %arg2[%c0_1, %c0_2] : memref<8x128xf32, #tpu.memory_space<vmem>>, vector<8x128xf32>
    tpu.vector_store %arg2[%c0_1, %c0_2], %3 {strides = array<i32>} : memref<8x128xf32, #tpu.memory_space<vmem>>, vector<8x128xf32>,
    return
  }
  func.func @transform_0(%arg0: i32) -> (i32, i32) {
    %c0_i32 = arith.constant 0 : i32
    %c0_i32_0 = arith.constant 0 : i32
    return %arg0, %c0_i32 : i32, i32
  }
  func.func @transform_1(%arg0: i32) -> (i32, i32) {
    %c0_i32 = arith.constant 0 : i32
    %c0_i32_0 = arith.constant 0 : i32
    return %arg0, %c0_i32 : i32, i32
  }
}

</mosaic_0001>

<bundles_post_ra>
// kernel: tpu_custom_call.1
= control target key start
LH: loop header
LB: loop body
LE: loop exit
PB: predicated region body
PF: predicated region fallthrough
CT: control target
= control target key end

     0   :  { %6 = vsyncpa [#allocation3], 0  ;;  %s523_s0 = inlined_call_operand.hbm [shape: f32[16,128], index: 0, kind: input, shape index: {}]   ;;  %s524_s1 = inlined_call_operand.hbm [shape: f32[16,128], index: 1, kind: output, shape index: {}]  }
   0x1   :  { %8 = vsyncpa [#allocation3 + $0x1], 0 }
   0x2   :  { %9 = vsyncpa [#allocation4], 0 }
   0x3   :  { %11 = vsyncpa [#allocation4 + $0x1], 0  ;;  %s396_s6 = smov 0   ;;  %s398_s7 = smov 0  }
   0x4   :  { %s400_s8 = smov 0   ;;  %s402_s9 = smov 0  }
   0x5 LB: > { %s417_s10 = sadd.s32 4294967295, %s384_s9   ;;  %s226_s11 = sadd.s32 4294967294, %s384_s9   ;;  %s384_s9 = sphi %s402_s9, %s534_s9   ;;  %s380_s8 = sphi %s400_s8, %s533_s8   ;;  %s376_s7 = sphi %s398_s7, %s532_s7   ;;  %s372_s6 = sphi %s396_s6, %s531_s6  }
   0x6   : > { %s421_s12 = sadd.s32 1, %s384_s9   ;;  %s24_s13 = sadd.s32 1, %s380_s8 }
   0x7   : > { %s21_s14 = ssub.s32 %s384_s9, %s421_s12  ;;  %p31_p0 = scmp.ne.s32.totalorder %s380_s8, %s376_s7 }
   0x8   : > { %p22_p1 = scmp.eq.s32.totalorder %s21_s14, 0  ;;  %p32_p2 = scmp.eq.s32.totalorder %s384_s9, 0 }
   0x9   : > { %p37_p3 = scmp.ne.s32.totalorder %s376_s7, %s372_s6  ;;  %p38_p4 = scmp.eq.s32.totalorder %s417_s10, 0 }
   0xa   : > { %s433_s15 = scalar_select %p22_p1, %s380_s8, %s24_s13  }
   0xb   : > { %p435_p5 = por %p32_p2, %p31_p0  ;;  %p439_p6 = por %p38_p4, %p37_p3 }
   0xc   : > { %p61_p7 = scmp.eq.s32.totalorder %s417_s10, 1  ;;  %p67_p8 = scmp.eq.s32.totalorder %s226_s11, 1 }
   0xd   : > { %p250_p10 = scmp.lt.s32.totalorder %s384_s9, 2  ;;  %s87_s20 = sand.u32 1, %s380_s8  }
   0xe   : > { %p446_p11 = por %p61_p7, %p31_p0  ;;  %p450_p12 = por %p67_p8, %p37_p3 }
   0xf   : > { %s230_s21 = sshll.u32 %s384_s9, 3  ;;  %s229_s22 = sshll.u32 %s87_s20, 3 }
  0x10   : > { %s95_s25 = scalar_lea.hbm %s523_s0, %s230_s21  ;;  %s91_s27 = scalar_lea.vmem [#allocation2], %s229_s22 }
  0x11   : > { %s97_s26 = sshll.u32 %s95_s25, 4  ;;  %s99_s28 = sshll.u32 %s91_s27, 4  ;;  %s98_s26 = int_to_ptr.hbm [resolvable:$true] %s97_s26  ;;  %s100_s28 = int_to_ptr.vmem [resolvable:$true] %s99_s28 }
  0x12   : > { %p461_p13 = pnand %p250_p10, %p435_p5  ;;  %p231_p0 = scmp.ge.s32.totalorder %s384_s9, 1 }
  0x13   : > { %p104_p1 = scmp.lt.s32.totalorder %s384_s9, 3  ;;  %s88_s30 = scalar_lea.sflag [#allocation3], %s87_s20 }
  0x14   : > { %s288_s2 = sshra.s32 %s98_s26, 4  ;;  %p292_p3 = pneg %p461_p13  ;;  %s289_s2 = int_to_ptr.hbm [resolvable:$true] %s288_s2 }
  0x15   : > { %s290_s3 = scalar_lea.hbm %s289_s2, 8  ;;  %s295_s11 = scalar_lea.hbm %s523_s0, 16 }
  0x16   : > { %p291_p2 = scmp.ne.s32.totalorder %s289_s2, %s290_s3  ;;  %p296_p5 = scmp.lt.s32.totalorder %s289_s2, %s523_s0 }
  0x17   : > { %p297_p8 = scmp.lt.s32.totalorder %s295_s11, %s290_s3 }
  0x18   : > { %p293_p4 = pnand %p292_p3, %p291_p2 }
  0x19   : > { %p298_p10 = por %p297_p8, %p296_p5 }
  0x1a   : > { %p294_p7 = pneg %p293_p4 }
  0x1c   : > { %p299_p9 = pnand %p298_p10, %p294_p7 }
  0x1e   : > { %302 = shalt.err (!%p299_p9)
}
  0x1f   : > { %245 = dma.hbm_to_vmem [thread:$0]  (!%p461_p13), %s98_s26, 128, %s100_s28, %s88_s30  }
  0x20   : > { %p105_p2 = pnand %p231_p0, %p104_p1 }
  0x21   : > { %s482_s16 = sand.u32 (!%p105_p2), 1, %s376_s7  }
  0x22   : > { %108 = sbr.rel (%p105_p2) target bundleno = 62 (0x3e), region = 24  ;;  %s232_s20 = sshll.u32 (!%p105_p2), %s482_s16, 3 }
  0x23   : > { %s111_s21 = scalar_lea.sflag (!%p105_p2), [#allocation3], %s482_s16  ;;  %s114_s22 = scalar_lea.vmem (!%p105_p2), [#allocation2], %s232_s20 }
  0x27   : > { %363 = dma.done.wait (%p439_p6), %s111_s21, 128  }
  0x28   : > { %365 = vsyncadd (%p439_p6), %s111_s21, 4294967168  ;;  %v134_v0 = vld [vmem:[%s114_s22] sm:$0xff]  ;;  %s235_s23 = sshll.u32 %s417_s10, 3  ;;  %s133_s27 = scalar_lea.vmem [#allocation5], %s232_s20 }
  0x29   : > { %v135_v1 = vmul.f32 1.442695, %v134_v0  ;;  %s151_s26 = scalar_lea.hbm %s524_s1, %s235_s23  ;;  %s153_s28 = sshll.u32 %s133_s27, 4  ;;  %s154_s28 = int_to_ptr.vmem [resolvable:$true] %s153_s28 }
  0x2a   : > { %s155_s29 = sshll.u32 %s151_s26, 4  ;;  %s141_s17 = scalar_lea.sflag [#allocation4], %s482_s16  ;;  %s156_s29 = int_to_ptr.hbm [resolvable:$true] %s155_s29 }
  0x2b   : > { %284 = vpow2.f32 %v135_v1  ;;  %s332_s30 = sshra.s32 %s156_s29, 4  ;;  %s338_s4 = scalar_lea.hbm %s524_s1, 16  ;;  %s333_s30 = int_to_ptr.hbm [resolvable:$true] %s332_s30 }
  0x2c   : > { %s334_s2 = scalar_lea.hbm %s333_s30, 8  ;;  %p339_p0 = scmp.lt.s32.totalorder %s333_s30, %s524_s1 }
  0x2d   : > { %p335_p6 = scmp.ne.s32.totalorder %s333_s30, %s334_s2  ;;  %p340_p1 = scmp.lt.s32.totalorder %s338_s4, %s334_s2 }
  0x2f   : > { %p336_p9 = pnand %p335_p6, %p446_p11  ;;  %p341_p3 = por %p340_p1, %p339_p0 }
  0x31   : > { %v285_v2 = vpop.eup %284  ;;  %p337_p13 = pneg %p336_p9 }
  0x32   : > { %286 = vtanh.f32 %v285_v2 }
  0x33   : > { %p342_p4 = pnand %p341_p3, %p337_p13 }
  0x38   : > { %v287_v3 = vpop.eup %286 }
  0x39   : > { %v138_v4 = vmul.f32 %v287_v3, %v134_v0 }
  0x3b   : > { %139 = vst [vmem:[%s133_s27] sm:$0xff] %v138_v4 }
  0x3c   : > { %345 = shalt.err (!%p342_p4)
}
  0x3d   : > { %240 = dma.vmem_to_hbm [thread:$0]  (%p446_p11), %s154_s28, 128, %s156_s29, %s141_s17  }
  0x3e PF: > { %s167_s13 = sand.u32 1, %s372_s6   ;;  %p530_p7 = scmp.ge.s32.totalorder %s384_s9, 2 }
  0x3f   : > { %s168_s14 = scalar_lea.sflag [#allocation4], %s167_s13 }
  0x40   : > { %p247_p5 = pnand %p530_p7, %p450_p12 }
  0x42   : > { %p248_p8 = pneg %p247_p5 }
  0x44   : > { %367 = dma.done.wait (%p248_p8), %s168_s14, 128  }
  0x45   : > { %369 = vsyncadd (%p248_p8), %s168_s14, 4294967168  ;;  %p14_p10 = scmp.ge.s32.totalorder %s421_s12, 4   ;;  %s531_s6 = smov %s376_s7 }
  0x46   : > { %s532_s7 = smov %s380_s8  ;;  %s533_s8 = smov %s433_s15 }
  0x47   : > { %s534_s9 = smov %s421_s12  ;;  %16 = sbr.rel (!%p14_p10) target bundleno = 5 (0x5), region = 69 }
  0x4c   :  { %174 = vsyncpa [#allocation3], 1 }
  0x4d   :  { %176 = vsyncpa [#allocation3 + $0x1], 1 }
  0x4e   :  { %177 = vsyncpa [#allocation4], 1 }
  0x4f   :  { %179 = vsyncpa [#allocation4 + $0x1], 1 }

</bundles_post_ra>
